<compile_context>
chip_gen: v7x
topology: tpu7x:2x2x1
jax: 0.10.0
libtpu: 0.0.40
codegen_flags: <defaults>
</compile_context>

<pallas_src>
import functools
import math

import numpy as np

import jax
import jax.numpy as jnp
from jax.experimental import pallas as pl
from jax.experimental.pallas import tpu as pltpu

PAD_LANES = 128                 # lane-aligned slot width for classifier heads / pair scores
NEG_INF = -1e30                 # pad bias so padded logit columns vanish from log-sum-exp
VMEM_LIMIT_BYTES = 32 * 1024 * 1024   # explicit scoped-VMEM budget (safe on v5e/v6e/v7x)

_VMEM = pl.BlockSpec(memory_space=pltpu.MemorySpace.VMEM)
_SMEM = pl.BlockSpec(memory_space=pltpu.MemorySpace.SMEM)


# ----------------------------------------------------------------------------
# In-kernel helpers
# ----------------------------------------------------------------------------

def _mean_cross_entropy(logits, labels):
    """Stable mean softmax cross-entropy (== F.cross_entropy).

    logits: (B, C) f32 (padded columns carry bias -1e30 -> exp underflows to 0)
    labels: (B, 1) int32
    """
    m = jnp.max(logits, axis=1, keepdims=True)
    lse = m + jnp.log(jnp.sum(jnp.exp(logits - m), axis=1, keepdims=True))
    col = jax.lax.broadcasted_iota(jnp.int32, logits.shape, 1)
    true_logit = jnp.sum(jnp.where(col == labels, logits, 0.0), axis=1, keepdims=True)
    return jnp.mean(lse - true_logit)


def _apply_ops(ops_f32, rep_f32):
    """ReLU(bmm(ops, rep.unsqueeze(2)).squeeze(2)): ops (N,E,E), rep (N,E) -> (N,E).

    TODO(synk): at emb_dim >= 128 replace with attribute-grouped MXU matmuls
    (scalar-prefetch sorted batch) so the contraction leaves the XLU.
    """
    return jnp.maximum(jnp.sum(ops_f32 * rep_f32[:, None, :], axis=-1), 0.0)


def _embed_image(img_f32, w_bf16, b_f32):
    """image_embedder = Linear + ReLU. bf16 MXU inputs, f32 accumulation + f32 epilogue."""
    h = jnp.dot(img_f32.astype(jnp.bfloat16), w_bf16, preferred_element_type=jnp.float32)
    return jnp.maximum(h + b_f32, 0.0)


# ----------------------------------------------------------------------------
# Kernel 1: per-attribute pair compose (batch-invariant, cached)
#   out[a, o, :] = ReLU( attr_ops[a] @ obj_emb[o] ) = ReLU( obj_emb @ attr_ops[a].T )
# ----------------------------------------------------------------------------

def _pair_compose_kernel(ops_ref, obj_ref, out_ref):
    op = ops_ref[0]                                            # (E, E) bf16
    emb = jax.lax.dot_general(obj_ref[...], op,                # (O, E) = obj @ op.T
                              dimension_numbers=(((1,), (1,)), ((), ())),
                              preferred_element_type=jnp.float32)
    out_ref[0] = jnp.maximum(emb, 0.0)


@jax.jit
def compose_pair_table(attr_ops_bf16, obj_emb_f32):
    A, E, _ = attr_ops_bf16.shape
    O = obj_emb_f32.shape[0]
    return pl.pallas_call(
        _pair_compose_kernel,
        out_shape=jax.ShapeDtypeStruct((A, O, E), jnp.float32),
        grid=(A,),
        in_specs=[pl.BlockSpec((1, E, E), lambda a: (a, 0, 0)),
                  pl.BlockSpec((O, E), lambda a: (0, 0))],
        out_specs=pl.BlockSpec((1, O, E), lambda a: (a, 0, 0)),
        compiler_params=pltpu.CompilerParams(
            dimension_semantics=("parallel",),
            vmem_limit_bytes=VMEM_LIMIT_BYTES),
    )(attr_ops_bf16, obj_emb_f32.astype(jnp.bfloat16))


# ----------------------------------------------------------------------------
# Kernel 2: fused training forward (embed + compose + triplet + aux CE -> scalar)
# ----------------------------------------------------------------------------

def _train_kernel(img_ref, wie_ref, bie_ref,
                  pos_ops_ref, pos_obj_ref, neg_ops_ref, neg_obj_ref,
                  wclf_ref, bclf_ref, attr_lab_ref, obj_lab_ref,
                  loss_ref, *, margin, lambda_aux):
    anchor = _embed_image(img_ref[...], wie_ref[...], bie_ref[...])           # (B, E) f32
    positive = _apply_ops(pos_ops_ref[...].astype(jnp.float32), pos_obj_ref[...])
    negative = _apply_ops(neg_ops_ref[...].astype(jnp.float32), neg_obj_ref[...])

    # F.triplet_margin_loss (p=2, eps=1e-6, reduction='mean').
    # NOTE: eps is added to the elementwise difference before squaring, exactly
    # matching F.pairwise_distance (so d(x,x) = sqrt(E)*eps, not 0).
    eps = 1e-6
    d_pos = jnp.sqrt(jnp.sum((anchor - positive + eps) ** 2, axis=1, keepdims=True))
    d_neg = jnp.sqrt(jnp.sum((anchor - negative + eps) ** 2, axis=1, keepdims=True))
    loss = jnp.mean(jnp.maximum(d_pos - d_neg + margin, 0.0))

    if lambda_aux > 0.0:
        # attr_clf | obj_clf fused into ONE wide (E, 256) bf16 MXU matmul; heads in
        # lane-aligned 128-column slots, padded bias = -1e30 so pads drop out of the
        # f32 log-sum-exp.  Logits never leave VMEM.
        logits = jnp.dot(positive.astype(jnp.bfloat16), wclf_ref[...],
                         preferred_element_type=jnp.float32) + bclf_ref[...]  # (B, 256)
        loss_aux = (_mean_cross_entropy(logits[:, :PAD_LANES], attr_lab_ref[...]) +
                    _mean_cross_entropy(logits[:, PAD_LANES:], obj_lab_ref[...]))
        loss = loss + lambda_aux * loss_aux

    loss_ref[0, 0] = loss


@functools.partial(jax.jit, static_argnames=("margin", "lambda_aux"))
def fused_train_forward(img, w_ie, b_ie, pos_ops, pos_obj, neg_ops, neg_obj,
                        w_clf, b_clf, attr_lab, obj_lab, *, margin, lambda_aux):
    kernel = functools.partial(_train_kernel, margin=margin, lambda_aux=lambda_aux)
    loss = pl.pallas_call(
        kernel,
        out_shape=jax.ShapeDtypeStruct((1, 1), jnp.float32),
        in_specs=[_VMEM] * 11,
        out_specs=_SMEM,
        compiler_params=pltpu.CompilerParams(vmem_limit_bytes=VMEM_LIMIT_BYTES),
    )(img, w_ie, b_ie, pos_ops, pos_obj, neg_ops, neg_obj,
      w_clf, b_clf, attr_lab, obj_lab)
    return loss[0, 0]


# ----------------------------------------------------------------------------
# Kernel 3: fused eval forward (embed + distance-as-matmul), tiled over pairs
#   score[b, p] = -||anchor[b] - pair[p]||^2
#              = 2*anchor@pair.T - ||anchor||^2 - ||pair||^2
# ----------------------------------------------------------------------------

def _eval_kernel(img_ref, wie_ref, bie_ref, pair_ref, psq_ref, score_ref):
    # Anchor embed is recomputed per pair-tile (tiny (B,F)@(F,E) matmul) so the
    # pair axis can stay "parallel" across TensorCores without scratch carry.
    anchor = _embed_image(img_ref[...], wie_ref[...], bie_ref[...])            # (B, E) f32
    a_sq = jnp.sum(anchor * anchor, axis=1, keepdims=True)                     # (B, 1) f32
    cross = jax.lax.dot_general(anchor.astype(jnp.bfloat16), pair_ref[...],    # (B, TP) f32
                                dimension_numbers=(((1,), (1,)), ((), ())),
                                preferred_element_type=jnp.float32)
    score_ref[...] = 2.0 * cross - a_sq - psq_ref[...]


@jax.jit
def fused_eval_forward(img, w_ie, b_ie, pair_emb_bf16, pair_sq_f32):
    B, F = img.shape
    P_pad, E = pair_emb_bf16.shape
    # Largest lane-aligned pair tile (256-512 preferred) that divides P_pad.
    tile_p = next(c for c in (512, 256, 128) if P_pad % c == 0)
    grid = (P_pad // tile_p,)
    return pl.pallas_call(
        _eval_kernel,
        out_shape=jax.ShapeDtypeStruct((B, P_pad), jnp.float32),
        grid=grid,
        in_specs=[pl.BlockSpec((B, F), lambda p: (0, 0)),
                  pl.BlockSpec((F, E), lambda p: (0, 0)),
                  pl.BlockSpec((1, E), lambda p: (0, 0)),
                  pl.BlockSpec((tile_p, E), lambda p: (p, 0)),
                  pl.BlockSpec((1, tile_p), lambda p: (0, p))],
        out_specs=pl.BlockSpec((B, tile_p), lambda p: (0, p)),   # lane-dense output slab
        compiler_params=pltpu.CompilerParams(
            dimension_semantics=("parallel",),
            vmem_limit_bytes=VMEM_LIMIT_BYTES),
    )(img, w_ie, b_ie, pair_emb_bf16, pair_sq_f32)


# ----------------------------------------------------------------------------
# Parameters / model (JAX-side glue, no heavy compute)
# ----------------------------------------------------------------------------

def _linear_params(key, in_dim, out_dim):
    """nn.Linear default init; weight stored pre-transposed as (in_dim, out_dim)."""
    kw, kb = jax.random.split(key)
    s = 1.0 / math.sqrt(in_dim)
    w = jax.random.uniform(kw, (in_dim, out_dim), jnp.float32, -s, s)
    b = jax.random.uniform(kb, (1, out_dim), jnp.float32, -s, s)
    return w, b


class DummyDset:
    def __init__(self, feat_dim, attrs, objs, pairs):
        self.feat_dim = feat_dim
        self.attrs, self.objs, self.pairs = attrs, objs, pairs
        self.attr2idx = {a: i for i, a in enumerate(attrs)}
        self.obj2idx = {o: i for i, o in enumerate(objs)}
        self.all_pair2idx = {p: i for i, p in enumerate(pairs)}


class Args:
    def __init__(self, emb_dim=32, margin=0.5, lambda_aux=0.5):
        self.emb_dim = emb_dim
        self.margin = margin
        self.lambda_aux = lambda_aux
        self.lambda_inv = 0.0
        self.lambda_comm = 0.0
        self.lambda_ant = 0.0
        self.lambda_cls_attr = 0.0
        self.lambda_cls_obj = 0.0
        self.emb_init = False
        self.static_inp = False
        self.train_only = False


class AttributeOperator:
    def __init__(self, dset, args, key):
        self.dset, self.args = dset, args
        E = args.emb_dim
        A, O = len(dset.attrs), len(dset.objs)
        k_ie, k_obj, k_aclf, k_oclf = jax.random.split(key, 4)

        # image_embedder = MLP(feat_dim, emb_dim)  (Linear -> ReLU); weight stored bf16.
        w_ie, b_ie = _linear_params(k_ie, dset.feat_dim, E)
        self.w_ie = w_ie.astype(jnp.bfloat16)
        self.b_ie = b_ie                                           # f32 epilogue

        # attr_ops: one (E, E) identity matrix per attribute (nn.Parameter(torch.eye));
        # stored bf16 (exact for identity) — MXU operand of the compose kernel.
        self.attr_ops = jnp.tile(jnp.eye(E, dtype=jnp.bfloat16)[None], (A, 1, 1))

        # obj_embedder: nn.Embedding default init N(0, 1)
        # TODO(synk): args.emb_init glove/fasttext/word2vec file loading not implemented.
        self.obj_emb = jax.random.normal(k_obj, (O, E), jnp.float32)

        # aux classifiers (lambda_aux > 0): fused into one padded (E, 256) bf16 weight;
        # attr head in lanes [0,128), obj head in lanes [128,256); pad bias = -1e30 (f32).
        w_a, b_a = _linear_params(k_aclf, E, A)
        w_o, b_o = _linear_params(k_oclf, E, O)
        w_clf = jnp.zeros((E, 2 * PAD_LANES), jnp.float32)
        b_clf = jnp.full((1, 2 * PAD_LANES), NEG_INF, jnp.float32)
        w_clf = w_clf.at[:, :A].set(w_a)
        w_clf = w_clf.at[:, PAD_LANES:PAD_LANES + O].set(w_o)
        b_clf = b_clf.at[:, :A].set(b_a[0])
        b_clf = b_clf.at[:, PAD_LANES:PAD_LANES + O].set(b_o[0])
        self.w_clf = w_clf.astype(jnp.bfloat16)
        self.b_clf = b_clf

        # ---- eval pair table (ManifoldModel.get_all_ids + compose), cached ONCE ----
        # Batch-invariant: compose per attribute on the MXU (A grid steps), then row-
        # gather the (P, E) pair embeddings and lane-pad.  No (P_pad, E, E) table.
        val_attrs = jnp.array([dset.attr2idx[a] for a, _ in dset.pairs], jnp.int32)
        val_objs = jnp.array([dset.obj2idx[o] for _, o in dset.pairs], jnp.int32)
        n_pairs = len(dset.pairs)
        p_pad = ((n_pairs + PAD_LANES - 1) // PAD_LANES) * PAD_LANES
        pair_table = compose_pair_table(self.attr_ops, self.obj_emb)       # (A, O, E) f32
        pair_emb = pair_table[val_attrs, val_objs]                         # (P, E) f32
        pair_emb = jnp.zeros((p_pad, E), jnp.float32).at[:n_pairs].set(pair_emb)
        # Norms computed in f32 BEFORE the bf16 cast (padding rows are zero -> score
        # for padded columns is -||anchor||^2: finite garbage, sliced off below).
        self.pair_sq = jnp.sum(pair_emb * pair_emb, axis=1).reshape(1, p_pad)
        self.pair_emb = pair_emb.astype(jnp.bfloat16)
        self.n_pairs = n_pairs

        self.inverse_cache = {}
        self.training = True

    # --- training path: one fused pallas_call ------------------------------
    def train_forward(self, x):
        img, attrs, objs = x[0], x[1], x[2]
        neg_attrs, neg_objs = x[4][:, 0], x[5][:, 0]
        # TODO(synk): at real B/E, replace these (B,E,E) gathers with a
        # PrefetchScalarGridSpec + pl.Element row-gather over the HBM-resident
        # (A,E,E) operator table.
        pos_ops = jnp.take(self.attr_ops, attrs, axis=0)      # (B, E, E) bf16
        pos_obj = jnp.take(self.obj_emb, objs, axis=0)        # (B, E) f32
        neg_ops = jnp.take(self.attr_ops, neg_attrs, axis=0)
        neg_obj = jnp.take(self.obj_emb, neg_objs, axis=0)
        loss = fused_train_forward(
            img, self.w_ie, self.b_ie, pos_ops, pos_obj, neg_ops, neg_obj,
            self.w_clf, self.b_clf,
            attrs.astype(jnp.int32).reshape(-1, 1),
            objs.astype(jnp.int32).reshape(-1, 1),
            margin=float(self.args.margin),
            lambda_aux=float(self.args.lambda_aux))
        # TODO(synk): lambda_inv / lambda_comm / lambda_ant loss branches
        # (torch.inverse + antonym file I/O) are not implemented (zero in this config).
        return loss, None

    # --- eval path (val_forward_distance_fast): one fused pallas_call -------
    def val_forward(self, x):
        img = x[0]
        score = fused_eval_forward(img, self.w_ie, self.b_ie,
                                   self.pair_emb, self.pair_sq)        # (B, P_pad)
        # ONE device->host transfer; per-pair dict built by host-side numpy slicing
        # (no per-pair device dispatches).
        score_np = np.asarray(jax.device_get(score))[:, :self.n_pairs]
        scores = {pair: score_np[:, self.dset.all_pair2idx[pair]]
                  for pair in self.dset.pairs}
        return None, scores

    def forward(self, x):
        out = self.train_forward(x) if self.training else self.val_forward(x)
        self.inverse_cache = {}
        return out


# ----------------------------------------------------------------------------
# Demo
# ----------------------------------------------------------------------------

if __name__ == "__main__":
    key = jax.random.PRNGKey(0)
    (k_param, k_img, k_a, k_o, k_na, k_no, k_ia, k_ca) = jax.random.split(key, 8)

    batch = 8
    feat_dim = 64
    attrs = [f"attr{i}" for i in range(16)]
    objs = [f"obj{i}" for i in range(12)]
    pairs = [(a, o) for a in attrs[:5] for o in objs[:4]]          # 20 (attr, obj) pairs

    dset = DummyDset(feat_dim, attrs, objs, pairs)
    args = Args(emb_dim=32, margin=0.5, lambda_aux=0.5)
    model = AttributeOperator(dset, args, k_param)

    img = jax.random.normal(k_img, (batch, feat_dim), jnp.float32)
    attr_lab = jax.random.randint(k_a, (batch,), 0, len(attrs), jnp.int32)
    obj_lab = jax.random.randint(k_o, (batch,), 0, len(objs), jnp.int32)
    neg_attrs = jax.random.randint(k_na, (batch, 1), 0, len(attrs), jnp.int32)
    neg_objs = jax.random.randint(k_no, (batch, 1), 0, len(objs), jnp.int32)
    inv_attrs = jax.random.randint(k_ia, (batch,), 0, len(attrs), jnp.int32)
    comm_attrs = jax.random.randint(k_ca, (batch,), 0, len(attrs), jnp.int32)

    x_train = (img, attr_lab, obj_lab, None, neg_attrs, neg_objs, inv_attrs, comm_attrs)

    # training path: scalar triplet + aux-CE loss from ONE fused kernel
    model.training = True
    loss, _ = model.forward(x_train)
    loss = jax.block_until_ready(loss)

    # eval path: per-pair distance scores from ONE fused kernel (lane-dense slab,
    # distance computed as an MXU matmul against the cached pair table)
    model.training = False
    _, scores = model.forward((img,))

    ok = bool(jnp.isfinite(loss)) and all(
        v.shape == (batch,) and bool(np.all(np.isfinite(v))) for v in scores.values()
    )
    print("KERNEL_OK" if ok else "KERNEL_FAILED")
</pallas_src>

<mosaic_0001>
module attributes {stable_mosaic.version = 11 : i64} {
  func.func @_pair_compose_kernel(%arg0: i32, %arg1: memref<1x32x32xbf16, #tpu.memory_space<vmem>>, %arg2: memref<12x32xbf16, #tpu.memory_space<vmem>>, %arg3: memref<1x12x32xf32, #tpu.memory_space<vmem>>) attributes {dimension_semantics = [#tpu.dimension_semantics<parallel>], iteration_bounds = array<i64: 16>, scalar_prefetch = 0 : i64, scratch_operands = 0 : i64, tpu.core_type = #tpu.core_type<tc>, window_params = [{transform_indices = @transform_0, window_bounds = array<i64: 1, 32, 32>}, {pipeline_mode = #tpu.pipeline_mode<synchronous>, transform_indices = @transform_1, window_bounds = array<i64: 12, 32>}, {transform_indices = @transform_2, window_bounds = array<i64: 1, 12, 32>}]} {
    %c0 = arith.constant 0 : index
    %c0_0 = arith.constant 0 : index
    %c0_1 = arith.constant 0 : index
    %0 = vector.load %arg1[%c0, %c0_0, %c0_1] : memref<1x32x32xbf16, #tpu.memory_space<vmem>>, vector<1x32x32xbf16>
    %1 = vector.shape_cast %0 : vector<1x32x32xbf16> to vector<32x32xbf16>
    %c0_2 = arith.constant 0 : index
    %c0_3 = arith.constant 0 : index
    %2 = vector.load %arg2[%c0_2, %c0_3] : memref<12x32xbf16, #tpu.memory_space<vmem>>, vector<12x32xbf16>
    %cst = arith.constant dense<0.000000e+00> : vector<12x32xf32>
    %3 = tpu.matmul %2, %1, %cst {dimension_numbers = #tpu.dot_dimension_numbers<[1], [1], [0], [0], [0, 0, 1, 0], [], []>} : vector<12x32xbf16>, vector<32x32xbf16>, vector<12x32xf32> -> vector<12x32xf32>
    %cst_4 = arith.constant 0.000000e+00 : f32
    %4 = vector.broadcast %cst_4 : f32 to vector<12x32xf32>
    %5 = arith.maximumf %3, %4 : vector<12x32xf32>
    %c0_5 = arith.constant 0 : index
    %c0_6 = arith.constant 0 : index
    %c0_7 = arith.constant 0 : index
    %6 = vector.load %arg3[%c0_5, %c0_6, %c0_7] : memref<1x12x32xf32, #tpu.memory_space<vmem>>, vector<1x12x32xf32>
    %7 = vector.shape_cast %6 : vector<1x12x32xf32> to vector<12x32xf32>
    %8 = vector.shape_cast %5 : vector<12x32xf32> to vector<1x12x32xf32>
    tpu.vector_store %arg3[%c0_5, %c0_6, %c0_7], %8 {strides = array<i32>} : memref<1x12x32xf32, #tpu.memory_space<vmem>>, vector<1x12x32xf32>,
    return
  }
  func.func @transform_0(%arg0: i32) -> (i32, i32, i32) {
    %c0_i32 = arith.constant 0 : i32
    %c0_i32_0 = arith.constant 0 : i32
    %c0_i32_1 = arith.constant 0 : i32
    return %arg0, %c0_i32, %c0_i32_0 : i32, i32, i32
  }
  func.func @transform_1(%arg0: i32) -> (i32, i32) {
    %c0_i32 = arith.constant 0 : i32
    %c0_i32_0 = arith.constant 0 : i32
    %c0_i32_1 = arith.constant 0 : i32
    return %c0_i32, %c0_i32_0 : i32, i32
  }
  func.func @transform_2(%arg0: i32) -> (i32, i32, i32) {
    %c0_i32 = arith.constant 0 : i32
    %c0_i32_0 = arith.constant 0 : i32
    %c0_i32_1 = arith.constant 0 : i32
    return %arg0, %c0_i32, %c0_i32_0 : i32, i32, i32
  }
}

</mosaic_0001>

<bundles_post_ra>
// kernel: compose_pair_table.1
= control target key start
LH: loop header
LB: loop body
LE: loop exit
PB: predicated region body
PF: predicated region fallthrough
CT: control target
= control target key end

     0   :  { %7 = vsyncpa [#allocation3], 0  ;;  %s585_s0 = inlined_call_operand.hbm [shape: bf16[16,32,32], index: 0, kind: input, shape index: {}]   ;;  %s586_s1 = inlined_call_operand.vmem [shape: bf16[12,32], index: 1, kind: input, shape index: {}]   ;;  %s587_s2 = inlined_call_operand.vmem [shape: f32[16,12,32], index: 2, kind: output, shape index: {}]  }
   0x1   :  { %9 = vsyncpa [#allocation3 + $0x1], 0  ;;  %s470_s9 = smov 0   ;;  %s472_s10 = smov 0  }
   0x2   :  { %s474_s11 = smov 0   ;;  %s476_s12 = smov 0  }
   0x3 LB: > { %s489_s13 = sadd.s32 4294967295, %s448_s12   ;;  %s492_s14 = sadd.s32 1, %s448_s12   ;;  %s448_s12 = sphi %s476_s12, %s594_s12   ;;  %s444_s11 = sphi %s474_s11, %s593_s11   ;;  %s440_s10 = sphi %s472_s10, %s592_s10   ;;  %s436_s9 = sphi %s470_s9, %s591_s9  }
   0x4   : > { %s19_s15 = ssub.s32 %s448_s12, %s492_s14  ;;  %s22_s16 = sadd.s32 1, %s444_s11 }
   0x5   : > { %p20_p0 = scmp.eq.s32.totalorder %s19_s15, 0  ;;  %p29_p1 = scmp.ne.s32.totalorder %s444_s11, %s440_s10 }
   0x6   : > { %p30_p2 = scmp.eq.s32.totalorder %s448_s12, 0  ;;  %p35_p3 = scmp.ne.s32.totalorder %s440_s10, %s436_s9 }
   0x7   : > { %s502_s17 = scalar_select %p20_p0, %s444_s11, %s22_s16  }
   0x8   : > { %p31_p4 = por %p30_p2, %p29_p1  ;;  %p36_p5 = scmp.eq.s32.totalorder %s489_s13, 0 }
   0x9   : > { %p344_p6 = scmp.lt.s32.totalorder %s448_s12, 16  ;;  %s109_s19 = sand.u32 1, %s444_s11  }
   0xa   : > { %p506_p7 = por %p36_p5, %p35_p3  ;;  %s312_s20 = sshll.u32 %s109_s19, 4 }
   0xb   : > { %s325_s21 = sshll.u32 %s448_s12, 8  ;;  %s113_s25 = scalar_lea.vmem [#allocation2], %s312_s20 }
   0xc   : > { %s515_s24 = scalar_lea.hbm %s585_s0, %s325_s21  ;;  %s120_s26 = sshll.u32 %s113_s25, 4  ;;  %s517_s26 = int_to_ptr.vmem [resolvable:$true] %s120_s26 }
   0xd   : > { %p519_p8 = pnand %p344_p6, %p31_p4  ;;  %s524_s28 = scalar_lea.sflag [#allocation3], %s109_s19 }
   0xe   : > { %s384_s29 = scalar_lea.hbm %s515_s24, 256  ;;  %s389_s4 = scalar_lea.hbm %s585_s0, 4096 }
   0xf   : > { %p385_p10 = scmp.ne.s32.totalorder %s515_s24, %s384_s29  ;;  %p386_p11 = pneg %p519_p8 }
  0x10   : > { %p390_p0 = scmp.lt.u32.totalorder %s515_s24, %s585_s0  ;;  %p391_p1 = scmp.lt.u32.totalorder %s389_s4, %s384_s29 }
  0x11   : > { %p387_p12 = pnand %p386_p11, %p385_p10  ;;  %p393_p3 = scmp.lt.u32.totalorder %s384_s29, %s515_s24 }
  0x12   : > { %p392_p2 = por %p391_p1, %p390_p0 }
  0x13   : > { %p388_p13 = pneg %p387_p12 }
  0x14   : > { %p394_p4 = por %p393_p3, %p392_p2 }
  0x16   : > { %p395_p5 = pnand %p394_p4, %p388_p13 }
  0x18   : > { %398 = shalt.err (!%p395_p5)
}
  0x19   : > { %s399_s7 = scalar_lea.vmem %s517_s26, 256  ;;  %s450_s8 = smov [#allocation2]  }
  0x1a   : > { %p400_p6 = scmp.ne.s32.totalorder %s517_s26, %s399_s7  ;;  %s404_s9 = sshll.u32 %s450_s8, 4  ;;  %s405_s9 = int_to_ptr.vmem [resolvable:$false] %s404_s9 }
  0x1b   : > { %s406_s15 = scalar_lea.vmem %s405_s9, 512  ;;  %p407_p9 = scmp.lt.s32.totalorder %s517_s26, %s405_s9 }
  0x1c   : > { %p402_p10 = pnand %p400_p6, %p386_p11  ;;  %p408_p0 = scmp.lt.s32.totalorder %s406_s15, %s399_s7 }
  0x1e   : > { %p403_p12 = pneg %p402_p10  ;;  %p409_p1 = por %p408_p0, %p407_p9 }
  0x20   : > { %p410_p2 = pnand %p409_p1, %p403_p12 }
  0x22   : > { %413 = shalt.err (!%p410_p2)
}
  0x23   : > { %s451_s16 = smov 64   ;;  %s452_s19 = smov 4  }
  0x24   : > { %343 = dma.hbm_to_vmem [thread:$0]  (!%p519_p8), %s515_s24, 256, %s517_s26, %s524_s28, %s451_s16, %s451_s16, %s452_s19  }
  0x25   : > { %p128_p11 = scmp.lt.s32.totalorder %s448_s12, 17  ;;  %p590_p13 = scmp.ge.s32.totalorder %s448_s12, 1 }
  0x27   : > { %p129_p3 = pnand %p590_p13, %p128_p11 }
  0x28   : > { %s134_s20 = sand.u32 (!%p129_p3), 1, %s440_s10  }
  0x29   : > { %132 = sbr.rel (%p129_p3) target bundleno = 283 (0x11b), region = 28  ;;  %s316_s21 = sshll.u32 (!%p129_p3), %s134_s20, 4 }
  0x2a   : > { %s135_s22 = scalar_lea.sflag (!%p129_p3), [#allocation3], %s134_s20  ;;  %s138_s23 = scalar_lea.vmem (!%p129_p3), [#allocation2], %s316_s21 }
  0x30   : > { %431 = dma.done.wait (%p506_p7), %s135_s22, 256  }
  0x31   : > { %433 = vsyncadd (%p506_p7), %s135_s22, 4294967040  ;;  %v453_v0 = vmov 0.0   ;;  %vm454_vm0 = vmmov 0   ;;  %vm186_vm1 = vcmask 261120   ;;  %v381_v1 = vld [vmem:[%s138_s23] sm:$0xff]   ;;  %v382_v3 = vld [vmem:[%s138_s23 + $0x8] sm:$0xff]  }
  0x32   : > { %330 = vmatprep.subr.bf16.mxu0 %v453_v0  ;;  %334 = vmatprep.mubr.msk.bf16.mxu0 %vm454_vm0, %v453_v0  ;;  %v191_v2 = vsel %vm186_vm1, %v381_v1, 0  ;;  %v194_v4 = vsel %vm186_vm1, %v382_v3, 0  ;;  %v383_v5 = vld [vmem:[%s586_s1] sm:$0x3f]   ;;  %p159_p7 = scmp.lt.s32.totalorder %s489_s13, 15  ;;  %vm240_vm2 = vcmask 257024  }
  0x33   : > { %331 = vmatpush3.bf16.xpose.msra.mxu0 %v191_v2 }
  0x34   : > { %332 = vmatprep.subr.bf16.mxu0 %v453_v0  ;;  %s596_s13 = smov (!%p159_p7, %s489_s13), 15 }
  0x35   : > { %s326_s18 = sshll.u32 %s596_s13, 4 }
  0x36   : > { %s163_s27 = scalar_lea.vmem %s587_s2, %s326_s18 }
  0x3b   : > { %333 = vmatpush3.bf16.xpose.msra.mxu0 %v194_v4 }
  0x42   : > { %335 = vmatmul.mubr.msk.bf16.vlgmr.msra.gmra.mrb[0].mxu0 %vm186_vm1, %v383_v5 }
 0x115   : > { %v230_v6 = vpop.f32.mrb[0].mxu0 }
 0x116   : > { %v237_v7 = vmax.f32 %v230_v6, 0.0  ;;  %v336_v8 = vpop.f32.mrb[1].mxu0 }
 0x117   : > { %v233_v9 = vpop.f32.mrb[2].mxu0 }
 0x118   : > { %239 = vst.msk [vmem:[%s163_s27] sm:$0xff] %vm186_vm1, %v237_v7  ;;  %v238_v10 = vmax.f32 %v233_v9, 0.0  ;;  %v337_v11 = vpop.f32.mrb[3].mxu0 }
 0x11a   : > { %241 = vst.msk [vmem:[%s163_s27 + $0x8] sm:$0xf] %vm240_vm2, %v238_v10 }
 0x11b PF: > { %p12_p8 = scmp.ge.s32.totalorder %s492_s14, 18   ;;  %s591_s9 = smov %s440_s10 }
 0x11c   : > { %s592_s10 = smov %s444_s11  ;;  %s593_s11 = smov %s502_s17 }
 0x11d   : > { %s594_s12 = smov %s492_s14  ;;  %14 = sbr.rel (!%p12_p8) target bundleno = 3 (0x3), region = 68 }
 0x124   :  { %263 = vsyncpa [#allocation3], 1 }
 0x125   :  { %265 = vsyncpa [#allocation3 + $0x1], 1 }

</bundles_post_ra>
